<compile_context>
chip_gen: v5e
topology: v5e:2x2
jax: 0.10.0
libtpu: 0.0.40
codegen_flags: <defaults>
</compile_context>

<pallas_src>
import functools

import jax
import jax.numpy as jnp
from jax.experimental import pallas as pl
from jax.experimental.pallas import tpu as pltpu

SMOOTH = 1e-6
_LANES = 128


def _dice_kernel(pred_ref, targ_ref, out_ref, inter_acc, p_acc, t_acc,
                 *, rows, tile_rows):
    """Grid axis 0 iterates over row tiles of the (N, R, 128) inputs.

    pred_ref/targ_ref: (N, TR, 128) tile of the reshaped inputs.
    out_ref:           (N, 1) per-sample dice loss (written on the last step).
    *_acc:             (N, 128) f32 lane-wise running sums.
    """
    k = pl.program_id(0)

    @pl.when(k == 0)
    def _():
        inter_acc[...] = jnp.zeros_like(inter_acc)
        p_acc[...] = jnp.zeros_like(p_acc)
        t_acc[...] = jnp.zeros_like(t_acc)

    p = jax.nn.sigmoid(pred_ref[...].astype(jnp.float32))   # (N, TR, 128)
    t = targ_ref[...].astype(jnp.float32)

    if rows % tile_rows != 0:
        # Ragged last tile: rows past the real extent hold unspecified data
        # (Pallas pads the overhanging block) -> zero them out.
        row_ids = k * tile_rows + jax.lax.broadcasted_iota(jnp.int32, p.shape, 1)
        valid = row_ids < rows
        p = jnp.where(valid, p, 0.0)
        t = jnp.where(valid, t, 0.0)

    # Reduce only over the tile-row (sublane) axis per step; keep 128 lane-wise
    # partials so the cross-lane reduction happens once, in the epilogue.
    inter_acc[...] += jnp.sum(p * t, axis=1)
    p_acc[...] += jnp.sum(p, axis=1)
    t_acc[...] += jnp.sum(t, axis=1)

    @pl.when(k == pl.num_programs(0) - 1)
    def _():
        inter = jnp.sum(inter_acc[...], axis=1, keepdims=True)   # (N, 1)
        psum = jnp.sum(p_acc[...], axis=1, keepdims=True)
        tsum = jnp.sum(t_acc[...], axis=1, keepdims=True)
        numerator = 2.0 * inter + SMOOTH
        denominator = psum + tsum + SMOOTH
        out_ref[...] = 1.0 - numerator / denominator


def _round_up(x, m):
    return (x + m - 1) // m * m


@functools.partial(jax.jit, static_argnames=("tile_rows", "reduction"))
def binary_dice_loss(predict, target, tile_rows=1024, reduction="mean"):
    """predict: (N, C, H, W) logits, target: (N, C, H, W) binary mask."""
    n = predict.shape[0]
    pred2d = predict.reshape(n, -1)
    targ2d = target.reshape(n, -1)
    f = pred2d.shape[1]

    # Lane alignment: C*H*W is almost always a multiple of 128; when it isn't,
    # pad minimally (<=127 elems/row) so the free (N, F)->(N, R, 128) reshape
    # works.  sigmoid(most-negative finite) == 0 and target pad == 0, so the
    # padded lanes contribute nothing to any of the three sums.
    lane_pad = (-f) % _LANES
    if lane_pad:
        if jnp.issubdtype(pred2d.dtype, jnp.floating):
            neg = jnp.finfo(pred2d.dtype).min
        else:
            neg = -(2 ** 30)
        pred2d = jnp.pad(pred2d, ((0, 0), (0, lane_pad)), constant_values=neg)
        targ2d = jnp.pad(targ2d, ((0, 0), (0, lane_pad)), constant_values=0)
        f += lane_pad

    rows = f // _LANES
    pred3d = pred2d.reshape(n, rows, _LANES)   # row-major: free reshape
    targ3d = targ2d.reshape(n, rows, _LANES)

    # Tile-size selection: the biggest sublane-dense (multiple-of-8) row tile
    # such that 2 inputs x 2 pipeline buffers x n x TR x 128 x itemsize stays
    # under ~8 MiB -> safe vs. the scoped-VMEM default on v5e/v6e/v7x and the
    # 64 MiB physical VMEM on v7x.
    vmem_budget = 8 * 1024 * 1024
    bytes_per_row = _LANES * (pred3d.dtype.itemsize + targ3d.dtype.itemsize) * 2
    tr_cap = max(8, (vmem_budget // (n * bytes_per_row)) // 8 * 8)
    tr = min(_round_up(tile_rows, 8), tr_cap, _round_up(rows, 8))

    grid = (pl.cdiv(rows, tr),)

    per_sample = pl.pallas_call(
        functools.partial(_dice_kernel, rows=rows, tile_rows=tr),
        out_shape=jax.ShapeDtypeStruct((n, 1), jnp.float32),
        grid_spec=pltpu.PrefetchScalarGridSpec(
            num_scalar_prefetch=0,
            grid=grid,
            in_specs=[
                pl.BlockSpec((n, tr, _LANES), lambda k: (0, k, 0)),
                pl.BlockSpec((n, tr, _LANES), lambda k: (0, k, 0)),
            ],
            # Full-array output block, held resident across the reduction axis.
            out_specs=pl.BlockSpec((n, 1), lambda k: (0, 0)),
            scratch_shapes=[
                pltpu.VMEM((n, _LANES), jnp.float32),
                pltpu.VMEM((n, _LANES), jnp.float32),
                pltpu.VMEM((n, _LANES), jnp.float32),
            ],
        ),
        compiler_params=pltpu.CompilerParams(
            dimension_semantics=("arbitrary",),
        ),
    )(pred3d, targ3d)

    per_sample = per_sample[:, 0]
    if reduction == "mean":
        return per_sample.mean()
    elif reduction == "sum":
        return per_sample.sum()
    elif reduction is None:
        return per_sample
    else:
        raise ValueError(f"Unexpected reduction {reduction}")


def _reference(predict, target):
    p = jax.nn.sigmoid(predict.reshape(predict.shape[0], -1).astype(jnp.float32))
    t = target.reshape(target.shape[0], -1).astype(jnp.float32)
    num = 2.0 * jnp.sum(p * t, axis=1) + SMOOTH
    den = jnp.sum(p, axis=1) + jnp.sum(t, axis=1) + SMOOTH
    return jnp.mean(1.0 - num / den)


if __name__ == "__main__":
    key = jax.random.PRNGKey(0)
    k1, k2 = jax.random.split(key)
    # predict: raw logits NCHW, target: binary mask NCHW
    predict = jax.random.normal(k1, (2, 4, 16, 16), dtype=jnp.float32)
    target = (jax.random.uniform(k2, (2, 4, 16, 16)) > 0.5).astype(jnp.float32)

    out = binary_dice_loss(predict, target)
    jax.block_until_ready(out)

    ref = _reference(predict, target)
    assert jnp.allclose(out, ref, atol=1e-5, rtol=1e-5), (out, ref)
    print("KERNEL_OK")
</pallas_src>

<mosaic_0001>
module attributes {stable_mosaic.version = 11 : i64} {
  func.func @_dice_kernel(%arg0: i32, %arg1: memref<2x8x128xf32, #tpu.memory_space<vmem>>, %arg2: memref<2x8x128xf32, #tpu.memory_space<vmem>>, %arg3: memref<2x1xf32, #tpu.memory_space<vmem>>, %arg4: memref<2x128xf32, #tpu.memory_space<vmem>>, %arg5: memref<2x128xf32, #tpu.memory_space<vmem>>, %arg6: memref<2x128xf32, #tpu.memory_space<vmem>>) attributes {dimension_semantics = [#tpu.dimension_semantics<arbitrary>], iteration_bounds = array<i64: 1>, scalar_prefetch = 0 : i64, scratch_operands = 3 : i64, tpu.core_type = #tpu.core_type<tc>, window_params = [{transform_indices = @transform_0, window_bounds = array<i64: 2, 8, 128>}, {transform_indices = @transform_1, window_bounds = array<i64: 2, 8, 128>}, {pipeline_mode = #tpu.pipeline_mode<synchronous>, transform_indices = @transform_2, window_bounds = array<i64: 2, 1>}]} {
    %c0_i32 = arith.constant 0 : i32
    %0 = arith.cmpi eq, %arg0, %c0_i32 : i32
    %1 = arith.extui %0 : i1 to i32
    %c0_i32_0 = arith.constant 0 : i32
    %2 = arith.cmpi ne, %1, %c0_i32_0 : i32
    scf.if %2 {
      %cst_23 = arith.constant 0.000000e+00 : f32
      %26 = vector.broadcast %cst_23 : f32 to vector<2x128xf32>
      %c0_24 = arith.constant 0 : index
      %c0_25 = arith.constant 0 : index
      %27 = vector.load %arg4[%c0_24, %c0_25] : memref<2x128xf32, #tpu.memory_space<vmem>>, vector<2x128xf32>
      tpu.vector_store %arg4[%c0_24, %c0_25], %26 {strides = array<i32>} : memref<2x128xf32, #tpu.memory_space<vmem>>, vector<2x128xf32>,
      %cst_26 = arith.constant 0.000000e+00 : f32
      %28 = vector.broadcast %cst_26 : f32 to vector<2x128xf32>
      %c0_27 = arith.constant 0 : index
      %c0_28 = arith.constant 0 : index
      %29 = vector.load %arg5[%c0_27, %c0_28] : memref<2x128xf32, #tpu.memory_space<vmem>>, vector<2x128xf32>
      tpu.vector_store %arg5[%c0_27, %c0_28], %28 {strides = array<i32>} : memref<2x128xf32, #tpu.memory_space<vmem>>, vector<2x128xf32>,
      %cst_29 = arith.constant 0.000000e+00 : f32
      %30 = vector.broadcast %cst_29 : f32 to vector<2x128xf32>
      %c0_30 = arith.constant 0 : index
      %c0_31 = arith.constant 0 : index
      %31 = vector.load %arg6[%c0_30, %c0_31] : memref<2x128xf32, #tpu.memory_space<vmem>>, vector<2x128xf32>
      tpu.vector_store %arg6[%c0_30, %c0_31], %30 {strides = array<i32>} : memref<2x128xf32, #tpu.memory_space<vmem>>, vector<2x128xf32>,
    } else {
    }
    %c0 = arith.constant 0 : index
    %c0_1 = arith.constant 0 : index
    %c0_2 = arith.constant 0 : index
    %3 = vector.load %arg1[%c0, %c0_1, %c0_2] : memref<2x8x128xf32, #tpu.memory_space<vmem>>, vector<2x8x128xf32>
    %4 = arith.negf %3 : vector<2x8x128xf32>
    %5 = math.exp %4 : vector<2x8x128xf32>
    %cst = arith.constant 1.000000e+00 : f32
    %6 = vector.broadcast %cst : f32 to vector<2x8x128xf32>
    %7 = arith.addf %6, %5 : vector<2x8x128xf32>
    %8 = arith.divf %6, %7 : vector<2x8x128xf32>
    %c0_3 = arith.constant 0 : index
    %c0_4 = arith.constant 0 : index
    %c0_5 = arith.constant 0 : index
    %9 = vector.load %arg2[%c0_3, %c0_4, %c0_5] : memref<2x8x128xf32, #tpu.memory_space<vmem>>, vector<2x8x128xf32>
    %c0_6 = arith.constant 0 : index
    %c0_7 = arith.constant 0 : index
    %10 = vector.load %arg4[%c0_6, %c0_7] : memref<2x128xf32, #tpu.memory_space<vmem>>, vector<2x128xf32>
    %11 = arith.mulf %8, %9 : vector<2x8x128xf32>
    %cst_8 = arith.constant dense<0.000000e+00> : vector<2x128xf32>
    %12 = vector.multi_reduction <add>, %11, %cst_8 [1] : vector<2x8x128xf32> to vector<2x128xf32>
    %13 = arith.addf %10, %12 : vector<2x128xf32>
    %c0_9 = arith.constant 0 : index
    %c0_10 = arith.constant 0 : index
    %14 = vector.load %arg4[%c0_9, %c0_10] : memref<2x128xf32, #tpu.memory_space<vmem>>, vector<2x128xf32>
    tpu.vector_store %arg4[%c0_9, %c0_10], %13 {strides = array<i32>} : memref<2x128xf32, #tpu.memory_space<vmem>>, vector<2x128xf32>,
    %c0_11 = arith.constant 0 : index
    %c0_12 = arith.constant 0 : index
    %15 = vector.load %arg5[%c0_11, %c0_12] : memref<2x128xf32, #tpu.memory_space<vmem>>, vector<2x128xf32>
    %cst_13 = arith.constant dense<0.000000e+00> : vector<2x128xf32>
    %16 = vector.multi_reduction <add>, %8, %cst_13 [1] : vector<2x8x128xf32> to vector<2x128xf32>
    %17 = arith.addf %15, %16 : vector<2x128xf32>
    %c0_14 = arith.constant 0 : index
    %c0_15 = arith.constant 0 : index
    %18 = vector.load %arg5[%c0_14, %c0_15] : memref<2x128xf32, #tpu.memory_space<vmem>>, vector<2x128xf32>
    tpu.vector_store %arg5[%c0_14, %c0_15], %17 {strides = array<i32>} : memref<2x128xf32, #tpu.memory_space<vmem>>, vector<2x128xf32>,
    %c0_16 = arith.constant 0 : index
    %c0_17 = arith.constant 0 : index
    %19 = vector.load %arg6[%c0_16, %c0_17] : memref<2x128xf32, #tpu.memory_space<vmem>>, vector<2x128xf32>
    %cst_18 = arith.constant dense<0.000000e+00> : vector<2x128xf32>
    %20 = vector.multi_reduction <add>, %9, %cst_18 [1] : vector<2x8x128xf32> to vector<2x128xf32>
    %21 = arith.addf %19, %20 : vector<2x128xf32>
    %c0_19 = arith.constant 0 : index
    %c0_20 = arith.constant 0 : index
    %22 = vector.load %arg6[%c0_19, %c0_20] : memref<2x128xf32, #tpu.memory_space<vmem>>, vector<2x128xf32>
    tpu.vector_store %arg6[%c0_19, %c0_20], %21 {strides = array<i32>} : memref<2x128xf32, #tpu.memory_space<vmem>>, vector<2x128xf32>,
    %c0_i32_21 = arith.constant 0 : i32
    %23 = arith.cmpi eq, %arg0, %c0_i32_21 : i32
    %24 = arith.extui %23 : i1 to i32
    %c0_i32_22 = arith.constant 0 : i32
    %25 = arith.cmpi ne, %24, %c0_i32_22 : i32
    scf.if %25 {
      %c0_23 = arith.constant 0 : index
      %c0_24 = arith.constant 0 : index
      %26 = vector.load %arg4[%c0_23, %c0_24] : memref<2x128xf32, #tpu.memory_space<vmem>>, vector<2x128xf32>
      %cst_25 = arith.constant dense<0.000000e+00> : vector<2xf32>
      %27 = vector.multi_reduction <add>, %26, %cst_25 [1] : vector<2x128xf32> to vector<2xf32>
      %28 = vector.shape_cast %27 : vector<2xf32> to vector<2x1xf32>
      %c0_26 = arith.constant 0 : index
      %c0_27 = arith.constant 0 : index
      %29 = vector.load %arg5[%c0_26, %c0_27] : memref<2x128xf32, #tpu.memory_space<vmem>>, vector<2x128xf32>
      %cst_28 = arith.constant dense<0.000000e+00> : vector<2xf32>
      %30 = vector.multi_reduction <add>, %29, %cst_28 [1] : vector<2x128xf32> to vector<2xf32>
      %31 = vector.shape_cast %30 : vector<2xf32> to vector<2x1xf32>
      %c0_29 = arith.constant 0 : index
      %c0_30 = arith.constant 0 : index
      %32 = vector.load %arg6[%c0_29, %c0_30] : memref<2x128xf32, #tpu.memory_space<vmem>>, vector<2x128xf32>
      %cst_31 = arith.constant dense<0.000000e+00> : vector<2xf32>
      %33 = vector.multi_reduction <add>, %32, %cst_31 [1] : vector<2x128xf32> to vector<2xf32>
      %34 = vector.shape_cast %33 : vector<2xf32> to vector<2x1xf32>
      %cst_32 = arith.constant 2.000000e+00 : f32
      %35 = vector.broadcast %cst_32 : f32 to vector<2x1xf32>
      %36 = arith.mulf %35, %28 : vector<2x1xf32>
      %cst_33 = arith.constant 9.99999997E-7 : f32
      %37 = vector.broadcast %cst_33 : f32 to vector<2x1xf32>
      %38 = arith.addf %36, %37 : vector<2x1xf32>
      %39 = arith.addf %31, %34 : vector<2x1xf32>
      %cst_34 = arith.constant 9.99999997E-7 : f32
      %40 = vector.broadcast %cst_34 : f32 to vector<2x1xf32>
      %41 = arith.addf %39, %40 : vector<2x1xf32>
      %42 = arith.divf %38, %41 : vector<2x1xf32>
      %cst_35 = arith.constant 1.000000e+00 : f32
      %43 = vector.broadcast %cst_35 : f32 to vector<2x1xf32>
      %44 = arith.subf %43, %42 : vector<2x1xf32>
      %c0_36 = arith.constant 0 : index
      %c0_37 = arith.constant 0 : index
      %45 = vector.load %arg3[%c0_36, %c0_37] : memref<2x1xf32, #tpu.memory_space<vmem>>, vector<2x1xf32>
      tpu.vector_store %arg3[%c0_36, %c0_37], %44 {strides = array<i32>} : memref<2x1xf32, #tpu.memory_space<vmem>>, vector<2x1xf32>,
    } else {
    }
    return
  }
  func.func @transform_0(%arg0: i32) -> (i32, i32, i32) {
    %c0_i32 = arith.constant 0 : i32
    %c0_i32_0 = arith.constant 0 : i32
    %c0_i32_1 = arith.constant 0 : i32
    return %c0_i32, %arg0, %c0_i32_0 : i32, i32, i32
  }
  func.func @transform_1(%arg0: i32) -> (i32, i32, i32) {
    %c0_i32 = arith.constant 0 : i32
    %c0_i32_0 = arith.constant 0 : i32
    %c0_i32_1 = arith.constant 0 : i32
    return %c0_i32, %arg0, %c0_i32_0 : i32, i32, i32
  }
  func.func @transform_2(%arg0: i32) -> (i32, i32) {
    %c0_i32 = arith.constant 0 : i32
    %c0_i32_0 = arith.constant 0 : i32
    %c0_i32_1 = arith.constant 0 : i32
    return %c0_i32, %c0_i32_0 : i32, i32
  }
}

</mosaic_0001>

<bundles_post_ra>
// kernel: binary_dice_loss.1
= control target key start
LH: loop header
LB: loop body
LE: loop exit
PB: predicated region body
PF: predicated region fallthrough
CT: control target
= control target key end

     0   :  { %v175_v0 = vmov 0.0   ;;  %vm77_vm1 = vcmask 1041409   ;;  %vm124_vm9 = vcmask 1041408   ;;  %vm156_vm14 = vcmask 1024   ;;  %s211_s0 = inlined_call_operand.vmem [shape: f32[2,8,128], index: 0, kind: input, shape index: {}]   ;;  %s212_s1 = inlined_call_operand.vmem [shape: f32[2,8,128], index: 1, kind: input, shape index: {}]   ;;  %s213_s2 = inlined_call_operand.vmem [shape: f32[2,1], index: 2, kind: output, shape index: {}]  }
   0x1   :  { %16 = vst [vmem:[#allocation3] sm:$0x3] %v175_v0  ;;  %v18_v1 = vld [vmem:[%s211_s0] sm:$0xff]  ;;  %v19_v2 = vld [vmem:[%s211_s0 + $0x8] sm:$0xff] }
   0x2   :  { %v162_v3 = vmul.f32 -1.442695, %v18_v1  ;;  %v163_v4 = vmul.f32 -1.442695, %v19_v2  ;;  %15 = vst [vmem:[#allocation2] sm:$0x3] %v175_v0 }
   0x3   :  { %17 = vst [vmem:[#allocation4] sm:$0x3] %v175_v0  ;;  %v58_v5 = vld [vmem:[%s212_s1] sm:$0xff]  ;;  %v59_v6 = vld [vmem:[%s212_s1 + $0x8] sm:$0xff] }
   0x4   :  { %165 = vpow2.f32 %v162_v3  ;;  %v102_v7 = vrot.slane %v58_v5, 4  ;;  %v108_v8 = vrot.slane %v59_v6, 4 }
   0x5   :  { %167 = vpow2.f32 %v163_v4 }
   0x6   :  { %v103_v9 = vadd.f32 %v102_v7, %v58_v5  ;;  %v109_v10 = vadd.f32 %v108_v8, %v59_v6 }
   0x8   :  { %v104_v14 = vrot.slane %v103_v9, 2  ;;  %v110_v16 = vrot.slane %v109_v10, 2  ;;  %v82_v4 = vld [vmem:[#allocation3] sm:$0x3] }
   0xa   :  { %v166_v11 = vpop.eup %165  ;;  %v105_v17 = vadd.f32 %v104_v14, %v103_v9  ;;  %v111_v18 = vadd.f32 %v110_v16, %v109_v10  ;;  %v101_v25 = vld [vmem:[#allocation4] sm:$0x3]  ;;  %v60_v9 = vld [vmem:[#allocation2] sm:$0x3] }
   0xb   :  { %v168_v12 = vpop.eup %167  ;;  %v26_v13 = vadd.f32 1.0, %v166_v11 }
   0xc   :  { %v27_v15 = vadd.f32 1.0, %v168_v12  ;;  %v106_v19 = vrot.slane %v105_v17, 1  ;;  %v112_v20 = vrot.slane %v111_v18, 1 }
   0xd   :  { %169 = vrcp.f32 %v26_v13  ;;  %vm33_vm0 = vweird.f32 %v26_v13  ;;  %v37_v27 = vand.u32 2147483647, %v26_v13  ;;  %v39_v28 = vand.u32 2147483648, %v26_v13 }
   0xe   :  { %171 = vrcp.f32 %v27_v15  ;;  %v107_v22 = vadd.f32 %v106_v19, %v105_v17  ;;  %v113_v26 = vadd.f32 %v112_v20, %v111_v18  ;;  %vm48_vm2 = vweird.f32 %v27_v15 }
   0xf   :  { %v54_v31 = vand.u32 2147483648, %v27_v15  ;;  %v52_v34 = vand.u32 2147483647, %v27_v15  ;;  %v40_v37 = vor.u32 1.1754944e-38, %v39_v28  ;;  %vm38_vm6 = vcmp.eq.f32.partialorder %v37_v27, 8.507059e+37 }
  0x10   :  { %v116_v32 = vsel %vm77_vm1, %v113_v26, %v107_v22 }
  0x11   :  { %v118_v35 = vadd.f32 %v116_v32, %v101_v25  ;;  %v55_v40 = vor.u32 1.1754944e-38, %v54_v31  ;;  %vm53_vm8 = vcmp.eq.f32.partialorder %v52_v34, 8.507059e+37 }
  0x13   :  { %v170_v21 = vpop.eup %169  ;;  %119 = vst [vmem:[#allocation4] sm:$0x3] %v118_v35 }
  0x14   :  { %v172_v23 = vpop.eup %171  ;;  %v29_v24 = vmul.f32 %v170_v21, %v26_v13  ;;  %vm34_vm3 = vweird.f32 %v170_v21 }
  0x15   :  { %v44_v29 = vmul.f32 %v172_v23, %v27_v15  ;;  %vm49_vm4 = vweird.f32 %v172_v23  ;;  %vm35_vm5 = vmor %vm33_vm0, %vm34_vm3 }
  0x16   :  { %v30_v30 = vsub.f32 1.0, %v29_v24  ;;  %vm50_vm7 = vmor %vm48_vm2, %vm49_vm4 }
  0x17   :  { %v45_v33 = vsub.f32 1.0, %v44_v29 }
  0x18   :  { %v31_v36 = vmul.f32 %v170_v21, %v30_v30 }
  0x19   :  { %v46_v38 = vmul.f32 %v172_v23, %v45_v33 }
  0x1a   :  { %v32_v39 = vadd.f32 %v170_v21, %v31_v36  ;;  %v132_v18 = vld [vmem:[#allocation4] sm:$0x3] }
  0x1b   :  { %v47_v41 = vadd.f32 %v172_v23, %v46_v38  ;;  %v133_v19 = vsel %vm124_vm9, %v132_v18, 0.0 }
  0x1c   :  { %v36_v42 = vsel %vm35_vm5, %v170_v21, %v32_v39 }
  0x1d   :  { %v41_v43 = vsel %vm38_vm6, %v40_v37, %v36_v42  ;;  %v51_v44 = vsel %vm50_vm7, %v172_v23, %v47_v41 }
  0x1e   :  { %v56_v45 = vsel %vm53_vm8, %v55_v40, %v51_v44  ;;  %v83_v46 = vrot.slane %v41_v43, 4  ;;  %v61_v47 = vmul.f32 %v58_v5, %v41_v43 }
  0x1f   :  { %v89_v48 = vrot.slane %v56_v45, 4  ;;  %v62_v49 = vmul.f32 %v59_v6, %v56_v45 }
  0x20   :  { %v84_v50 = vadd.f32 %v83_v46, %v41_v43  ;;  %v63_v51 = vrot.slane %v61_v47, 4 }
  0x21   :  { %v90_v52 = vadd.f32 %v89_v48, %v56_v45  ;;  %v69_v53 = vrot.slane %v62_v49, 4 }
  0x22   :  { %v85_v54 = vrot.slane %v84_v50, 2  ;;  %v64_v55 = vadd.f32 %v63_v51, %v61_v47 }
  0x23   :  { %v91_v56 = vrot.slane %v90_v52, 2  ;;  %v70_v57 = vadd.f32 %v69_v53, %v62_v49 }
  0x24   :  { %v86_v58 = vadd.f32 %v85_v54, %v84_v50  ;;  %v65_v59 = vrot.slane %v64_v55, 2 }
  0x25   :  { %v92_v60 = vadd.f32 %v91_v56, %v90_v52  ;;  %v71_v61 = vrot.slane %v70_v57, 2 }
  0x26   :  { %v87_v62 = vrot.slane %v86_v58, 1  ;;  %v66_v63 = vadd.f32 %v65_v59, %v64_v55 }
  0x27   :  { %v93_v0 = vrot.slane %v92_v60, 1  ;;  %v72_v1 = vadd.f32 %v71_v61, %v70_v57 }
  0x28   :  { %v88_v2 = vadd.f32 %v87_v62, %v86_v58  ;;  %v67_v3 = vrot.slane %v66_v63, 1 }
  0x29   :  { %v94_v5 = vadd.f32 %v93_v0, %v92_v60  ;;  %v73_v6 = vrot.slane %v72_v1, 1 }
  0x2a   :  { %v68_v7 = vadd.f32 %v67_v3, %v66_v63 }
  0x2b   :  { %v97_v8 = vsel %vm77_vm1, %v94_v5, %v88_v2  ;;  %v74_v10 = vadd.f32 %v73_v6, %v72_v1 }
  0x2c   :  { %v99_v11 = vadd.f32 %v97_v8, %v82_v4 }
  0x2d   :  { %v78_v12 = vsel %vm77_vm1, %v74_v10, %v68_v7 }
  0x2e   :  { %100 = vst [vmem:[#allocation3] sm:$0x3] %v99_v11  ;;  %v80_v13 = vadd.f32 %v78_v12, %v60_v9 }
  0x30   :  { %81 = vst [vmem:[#allocation2] sm:$0x3] %v80_v13 }
  0x35   :  { %v128_v14 = vld [vmem:[#allocation3] sm:$0x3] }
  0x36   :  { %v129_v15 = vsel %vm124_vm9, %v128_v14, 0.0 }
  0x37   :  { %130 = vadd.xlane.f32.xlu0 %v129_v15  ;;  %v123_v16 = vld [vmem:[#allocation2] sm:$0x3] }
  0x38   :  { %v125_v17 = vsel %vm124_vm9, %v123_v16, 0.0 }
  0x39   :  { %126 = vadd.xlane.f32.xlu1 %v125_v17 }
  0x3f   :  { %134 = vadd.xlane.f32.xlu0 %v133_v19 }
  0xaa   :  { %v131_v20 = vpop.xlane.xlu0 %130 }
  0xac   :  { %v127_v25 = vpop.xlane.xlu1 %126 }
  0xad   :  { %v136_v28 = vmul.f32 2.0, %v127_v25 }
  0xaf   :  { %v137_v33 = vadd.f32 1e-06, %v136_v28 }
  0xb2   :  { %v135_v21 = vpop.xlane.xlu0 %134 }
  0xb3   :  { %v138_v22 = vadd.f32 %v135_v21, %v131_v20 }
  0xb5   :  { %v139_v23 = vadd.f32 1e-06, %v138_v22 }
  0xb7   :  { %173 = vrcp.f32 %v139_v23  ;;  %v151_v29 = vand.u32 2147483648, %v139_v23  ;;  %v149_v31 = vand.u32 2147483647, %v139_v23  ;;  %vm145_vm11 = vweird.f32 %v139_v23 }
  0xb9   :  { %v152_v34 = vor.u32 1.1754944e-38, %v151_v29  ;;  %vm150_vm13 = vcmp.eq.f32.partialorder %v149_v31, 8.507059e+37 }
  0xbd   :  { %v174_v24 = vpop.eup %173 }
  0xbe   :  { %v141_v26 = vmul.f32 %v174_v24, %v139_v23  ;;  %vm146_vm10 = vweird.f32 %v174_v24 }
  0xbf   :  { %vm147_vm12 = vmor %vm145_vm11, %vm146_vm10 }
  0xc0   :  { %v142_v27 = vsub.f32 1.0, %v141_v26 }
  0xc2   :  { %v143_v30 = vmul.f32 %v174_v24, %v142_v27 }
  0xc4   :  { %v144_v32 = vadd.f32 %v174_v24, %v143_v30 }
  0xc6   :  { %v148_v35 = vsel %vm147_vm12, %v174_v24, %v144_v32 }
  0xc7   :  { %v153_v36 = vsel %vm150_vm13, %v152_v34, %v148_v35 }
  0xc8   :  { %v154_v37 = vmul.f32 %v153_v36, %v137_v33 }
  0xca   :  { %v155_v38 = vsub.f32 1.0, %v154_v37 }
  0xcc   :  { %157 = vst.msk [vmem:[%s213_s2] sm:$0x3] %vm156_vm14, %v155_v38 }

</bundles_post_ra>
